<compile_context>
chip_gen: v6e
topology: v6e:2x2x1
jax: 0.10.0
libtpu: 0.0.40
codegen_flags: <defaults>
</compile_context>

<pallas_src>
import functools

import jax
import jax.numpy as jnp
from jax.experimental import pallas as pl
from jax.experimental.pallas import tpu as pltpu

# SELU constants (match torch.nn.functional.selu)
_SELU_ALPHA = 1.6732632423543772
_SELU_SCALE = 1.0507009873554805


def _selu(x):
    # exp(x) in the untaken positive branch may be inf; benign under the
    # jnp.where select.
    return _SELU_SCALE * jnp.where(x > 0, x, _SELU_ALPHA * (jnp.exp(x) - 1.0))


def _rup(x, m):
    return (x + m - 1) // m * m


def _cdiv(a, b):
    return -(-a // b)


# --------------------------------------------------------------------------
# Kernel
# --------------------------------------------------------------------------
def critic_kernel(x_ref, p_ref, out_ref, *, offs, in_pad, cols):
    f32 = jnp.float32
    x = x_ref[...]                                            # (TB, in_pad)

    # Static slices of the resident packed-parameter buffer (free).
    win = p_ref[offs["win"]:offs["win"] + in_pad, :]          # (in_pad, 2*cols)
    w2h = p_ref[offs["w2h"]:offs["w2h"] + cols, 0:cols]       # (cols, cols)
    w3 = p_ref[offs["w3"]:offs["w3"] + cols, 0:cols]          # (cols, cols)
    w4r = p_ref[offs["w4"]:offs["w4"] + 1, 0:cols]            # (1, cols)
    b = p_ref[offs["b"]:offs["b"] + 8, 0:cols]                # aligned 8-row load
    b1 = b[0:1, :].astype(f32)
    b2 = b[1:2, :].astype(f32)
    b3 = b[2:3, :].astype(f32)
    b4 = b[3:4, 0:1].astype(f32)

    # Fused input layer: one MXU pass produces both ob@W1 (cols [0:cols]) and
    # act@W2a (cols [cols:2*cols]) from the block-diagonal weight.
    z = jnp.dot(x, win, preferred_element_type=f32)           # (TB, 2*cols)

    # hid1: selu(ob @ W1 + b1)
    h1 = _selu(z[:, 0:cols] + b1)

    # hid2: selu(cat([h1, act]) @ W2 + b2) == selu(h1@W2_h + act@W2_a + b2)
    h2 = _selu(jnp.dot(h1.astype(w2h.dtype), w2h, preferred_element_type=f32)
               + z[:, cols:2 * cols] + b2)

    # hid3: selu(h2 @ W3 + b3)
    h3 = _selu(jnp.dot(h2.astype(w3.dtype), w3, preferred_element_type=f32) + b3)

    # out: only column 0 of h3 @ W4 is needed -> VPU/XLU row-dot + b4.
    q = jnp.sum(h3 * w4r.astype(f32), axis=-1, keepdims=True) + b4   # (TB, 1)

    # Lane-dense store: broadcast across 128 lanes; wrapper keeps column 0.
    out_ref[...] = jnp.broadcast_to(q, (q.shape[0], 128)).astype(out_ref.dtype)


# --------------------------------------------------------------------------
# Parameter packing: ONE zero-padded buffer, 8-aligned rows, 128-aligned cols
# --------------------------------------------------------------------------
def pack_params(params, ob_dim, act_dim, hid1_dim, hid2_dim, hid3_dim,
                dtype=jnp.float32):
    """Pack all weights/biases into one (n_rows, 2*cols) buffer.

    Layout (all row offsets 8-aligned; zero padding is exact through SELU):
      rows [win : win+in_pad]  block-diag [[W1, 0], [0, W2a]]   width 2*cols
      rows [w2h : w2h+cols]    W2h in columns [0:cols]
      rows [w3  : w3 +cols]    W3  in columns [0:cols]
      rows [w4  : w4 +8]       row 0, cols [0:hid3] = W4[:, 0]
      rows [b   : b  +8]       rows 0..3 = b1, b2, b3, b4(col 0)
    """
    w1, b1, w2h, w2a, b2, w3, b3, w4, b4 = params
    cols = _rup(max(hid1_dim, hid2_dim, hid3_dim), 128)   # lane-aligned width
    wcol = 2 * cols
    in_pad = _rup(ob_dim + act_dim, 8)

    offs = {}
    off = 0

    def alloc(name, rows):
        nonlocal off
        offs[name] = off
        off += _rup(rows, 8)

    alloc("win", in_pad)
    alloc("w2h", cols)
    alloc("w3", cols)
    alloc("w4", 8)
    alloc("b", 8)
    n_rows = off

    buf = jnp.zeros((n_rows, wcol), jnp.float32)
    # Block-diagonal input-layer weight.
    buf = buf.at[offs["win"]:offs["win"] + ob_dim, 0:hid1_dim].set(w1)
    buf = buf.at[offs["win"] + ob_dim:offs["win"] + ob_dim + act_dim,
                 cols:cols + hid2_dim].set(w2a)
    buf = buf.at[offs["w2h"]:offs["w2h"] + hid1_dim, 0:hid2_dim].set(w2h)
    buf = buf.at[offs["w3"]:offs["w3"] + hid2_dim, 0:hid3_dim].set(w3)
    buf = buf.at[offs["w4"], 0:hid3_dim].set(w4.reshape(-1))
    buf = buf.at[offs["b"] + 0, 0:hid1_dim].set(b1.reshape(-1))
    buf = buf.at[offs["b"] + 1, 0:hid2_dim].set(b2.reshape(-1))
    buf = buf.at[offs["b"] + 2, 0:hid3_dim].set(b3.reshape(-1))
    buf = buf.at[offs["b"] + 3, 0:1].set(b4.reshape(-1))
    return buf.astype(dtype), offs, cols, in_pad


# --------------------------------------------------------------------------
# Wrapper: batch-tiled, pipelined pallas_call
# --------------------------------------------------------------------------
def critic_forward(ob, act, packed, offs, *, in_pad, cols, tb=1024):
    """ob: (B, ob_dim), act: (B, act_dim) -> (B, 1) float32."""
    B = ob.shape[0]
    in_dim = ob.shape[1] + act.shape[1]
    n_rows, wcol = packed.shape

    # Concatenate once in the wrapper; the kernel uses block-diagonal math.
    x = jnp.concatenate([ob, act], axis=1)
    if in_pad != in_dim:
        x = jnp.pad(x, ((0, 0), (0, in_pad - in_dim)))
    x = x.astype(packed.dtype)

    # >=2 grid steps when possible so the "parallel" batch axis can shard
    # across v7x's two TensorCores (harmless on v5e/v6e).
    TB = min(tb, _rup(_cdiv(B, 2), 8))
    B_pad = _rup(B, TB)
    if B_pad != B:
        x = jnp.pad(x, ((0, B_pad - B), (0, 0)))
    num_tiles = B_pad // TB

    kernel = functools.partial(critic_kernel, offs=offs, in_pad=in_pad,
                               cols=cols)

    x_item = jnp.dtype(x.dtype).itemsize
    p_item = jnp.dtype(packed.dtype).itemsize

    flops = 2 * B_pad * (in_pad * 2 * cols + 2 * cols * cols + cols)
    transcendentals = 3 * B_pad * cols
    bytes_accessed = (B_pad * in_pad * x_item + n_rows * wcol * p_item
                      + B_pad * 128 * 4)

    # Tight VMEM request derived from the working set (leaves headroom on
    # v7x's 64 MiB / TC; far below the old fixed 48 MiB ask for small nets).
    params_bytes = n_rows * wcol * p_item
    working = (2 * params_bytes                 # resident params block buffers
               + 2 * TB * in_pad * x_item       # double-buffered input tiles
               + 2 * TB * 128 * 4               # double-buffered output tiles
               + 8 * TB * cols * 4)             # live f32 intermediates
    vmem_limit = int(min(96 << 20, max(8 << 20, 2 * working)))

    out = pl.pallas_call(
        kernel,
        out_shape=jax.ShapeDtypeStruct((B_pad, 128), jnp.float32),
        grid_spec=pltpu.PrefetchScalarGridSpec(
            num_scalar_prefetch=0,
            grid=(num_tiles,),
            in_specs=[
                pl.BlockSpec((TB, in_pad), lambda i: (i, 0)),    # streamed
                pl.BlockSpec((n_rows, wcol), lambda i: (0, 0)),  # resident
                # TODO(synk): single-buffer the resident params
                # (pipeline_mode=pl.Buffered(1)) once verified on the target
                # jax version; constant index_map never re-DMAs anyway.
            ],
            out_specs=pl.BlockSpec((TB, 128), lambda i: (i, 0)),
        ),
        compiler_params=pltpu.CompilerParams(
            dimension_semantics=("parallel",),   # 2 TCs on v7x
            vmem_limit_bytes=vmem_limit,
        ),
        cost_estimate=pl.CostEstimate(
            flops=flops,
            transcendentals=transcendentals,
            bytes_accessed=bytes_accessed,
        ),
    )(x, packed)

    return out[:B, 0:1]


# --------------------------------------------------------------------------
# Synthetic init (mirrors Critic.reset_parameters('normal') closely enough
# for a kernel demo; PyTorch biases default to uniform(+-1/sqrt(fan_in))).
# --------------------------------------------------------------------------
def init_critic_params(key, ob_dim, act_dim, hid1_dim, hid2_dim, hid3_dim,
                       init_w=0.003):
    ks = jax.random.split(key, 9)

    def normal(k, shape, std):
        return (std * jax.random.normal(k, shape)).astype(jnp.float32)

    def uniform(k, shape, v):
        return jax.random.uniform(k, shape, jnp.float32, minval=-v, maxval=v)

    # fanin_init('normal') uses std = 1/sqrt(weight.size(0)) = 1/sqrt(out).
    w1 = normal(ks[0], (ob_dim, hid1_dim), 1.0 / jnp.sqrt(hid1_dim))
    b1 = uniform(ks[1], (1, hid1_dim), 1.0 / jnp.sqrt(ob_dim))

    std2 = 1.0 / jnp.sqrt(hid2_dim)
    w2h = normal(ks[2], (hid1_dim, hid2_dim), std2)
    w2a = normal(ks[3], (act_dim, hid2_dim), std2)
    b2 = uniform(ks[4], (1, hid2_dim), 1.0 / jnp.sqrt(hid1_dim + act_dim))

    w3 = normal(ks[5], (hid2_dim, hid3_dim), 1.0 / jnp.sqrt(hid3_dim))
    b3 = uniform(ks[6], (1, hid3_dim), 1.0 / jnp.sqrt(hid2_dim))

    w4 = normal(ks[7], (hid3_dim, 1), init_w)
    b4 = uniform(ks[8], (1, 1), 1.0 / jnp.sqrt(hid3_dim))

    return (w1, b1, w2h, w2a, b2, w3, b3, w4, b4)


if __name__ == "__main__":
    key = jax.random.PRNGKey(0)
    k_ob, k_act, k_param = jax.random.split(key, 3)

    # Small shapes implied by the module's forward; batch=16 -> 2 grid tiles.
    batch, ob_dim, act_dim = 16, 16, 4
    hid1_dim, hid2_dim, hid3_dim = 32, 32, 32

    ob = jax.random.normal(k_ob, (batch, ob_dim), dtype=jnp.float32)
    act = jax.random.normal(k_act, (batch, act_dim), dtype=jnp.float32)
    params = init_critic_params(k_param, ob_dim, act_dim,
                                hid1_dim, hid2_dim, hid3_dim)

    # f32 for the exactness check; pass dtype=jnp.bfloat16 on v6e/v7x training
    # to halve HBM traffic (dots still accumulate in f32).
    packed, offs, cols, in_pad = pack_params(params, ob_dim, act_dim,
                                             hid1_dim, hid2_dim, hid3_dim)

    out = critic_forward(ob, act, packed, offs, in_pad=in_pad, cols=cols)
    out = jax.block_until_ready(out)

    # Reference check in plain JAX (same math, unpacked params).
    w1, b1, w2h, w2a, b2, w3, b3, w4, b4 = params
    h1 = _selu(ob @ w1 + b1)
    h2 = _selu(h1 @ w2h + act @ w2a + b2)
    h3 = _selu(h2 @ w3 + b3)
    ref = h3 @ w4 + b4

    assert out.shape == (batch, 1)
    assert jnp.allclose(out, ref, atol=1e-4, rtol=1e-4), \
        float(jnp.max(jnp.abs(out - ref)))

    print("KERNEL_OK")
</pallas_src>

<mosaic_0001>
module attributes {stable_mosaic.version = 11 : i64} {
  func.func @critic_kernel(%arg0: i32, %arg1: memref<8x24xf32, #tpu.memory_space<vmem>>, %arg2: memref<296x256xf32, #tpu.memory_space<vmem>>, %arg3: memref<8x128xf32, #tpu.memory_space<vmem>>) attributes {dimension_semantics = [#tpu.dimension_semantics<parallel>], iteration_bounds = array<i64: 2>, scalar_prefetch = 0 : i64, scratch_operands = 0 : i64, tpu.core_type = #tpu.core_type<tc>, window_params = [{transform_indices = @transform_0, window_bounds = array<i64: 8, 24>}, {pipeline_mode = #tpu.pipeline_mode<synchronous>, transform_indices = @transform_1, window_bounds = array<i64: 296, 256>}, {transform_indices = @transform_2, window_bounds = array<i64: 8, 128>}]} {
    %c0 = arith.constant 0 : index
    %c0_0 = arith.constant 0 : index
    %0 = vector.load %arg1[%c0, %c0_0] : memref<8x24xf32, #tpu.memory_space<vmem>>, vector<8x24xf32>
    %c0_1 = arith.constant 0 : index
    %c0_2 = arith.constant 0 : index
    %1 = vector.load %arg2[%c0_1, %c0_2] : memref<296x256xf32, #tpu.memory_space<vmem>>, vector<24x256xf32>
    %c24 = arith.constant 24 : index
    %c0_3 = arith.constant 0 : index
    %2 = vector.load %arg2[%c24, %c0_3] : memref<296x256xf32, #tpu.memory_space<vmem>>, vector<128x128xf32>
    %c152 = arith.constant 152 : index
    %c0_4 = arith.constant 0 : index
    %3 = vector.load %arg2[%c152, %c0_4] : memref<296x256xf32, #tpu.memory_space<vmem>>, vector<128x128xf32>
    %c280 = arith.constant 280 : index
    %c0_5 = arith.constant 0 : index
    %4 = vector.load %arg2[%c280, %c0_5] : memref<296x256xf32, #tpu.memory_space<vmem>>, vector<1x128xf32>
    %c288 = arith.constant 288 : index
    %c0_6 = arith.constant 0 : index
    %5 = vector.load %arg2[%c288, %c0_6] : memref<296x256xf32, #tpu.memory_space<vmem>>, vector<8x128xf32>
    %6 = vector.extract_strided_slice %5 {offsets = [0, 0], sizes = [1, 128], strides = [1, 1]} : vector<8x128xf32> to vector<1x128xf32>
    %7 = vector.extract_strided_slice %5 {offsets = [1, 0], sizes = [1, 128], strides = [1, 1]} : vector<8x128xf32> to vector<1x128xf32>
    %8 = vector.extract_strided_slice %5 {offsets = [2, 0], sizes = [1, 128], strides = [1, 1]} : vector<8x128xf32> to vector<1x128xf32>
    %9 = vector.extract_strided_slice %5 {offsets = [3, 0], sizes = [1, 1], strides = [1, 1]} : vector<8x128xf32> to vector<1x1xf32>
    %cst = arith.constant dense<0.000000e+00> : vector<8x256xf32>
    %10 = tpu.matmul %0, %1, %cst {dimension_numbers = #tpu.dot_dimension_numbers<[1], [0], [0], [1], [0, 0, 1, 1], [], []>} : vector<8x24xf32>, vector<24x256xf32>, vector<8x256xf32> -> vector<8x256xf32>
    %11 = vector.extract_strided_slice %10 {offsets = [0, 0], sizes = [8, 128], strides = [1, 1]} : vector<8x256xf32> to vector<8x128xf32>
    %12 = vector.broadcast %6 : vector<1x128xf32> to vector<8x128xf32>
    %13 = arith.addf %11, %12 : vector<8x128xf32>
    %cst_7 = arith.constant 0.000000e+00 : f32
    %14 = vector.broadcast %cst_7 : f32 to vector<8x128xf32>
    %15 = arith.cmpf ogt, %13, %14 : vector<8x128xf32>
    %16 = math.exp %13 : vector<8x128xf32>
    %cst_8 = arith.constant 1.000000e+00 : f32
    %17 = vector.broadcast %cst_8 : f32 to vector<8x128xf32>
    %18 = arith.subf %16, %17 : vector<8x128xf32>
    %cst_9 = arith.constant 1.67326319 : f32
    %19 = vector.broadcast %cst_9 : f32 to vector<8x128xf32>
    %20 = arith.mulf %19, %18 : vector<8x128xf32>
    %21 = arith.select %15, %13, %20 : vector<8x128xi1>, vector<8x128xf32>
    %cst_10 = arith.constant 1.05070102 : f32
    %22 = vector.broadcast %cst_10 : f32 to vector<8x128xf32>
    %23 = arith.mulf %22, %21 : vector<8x128xf32>
    %cst_11 = arith.constant dense<0.000000e+00> : vector<8x128xf32>
    %24 = tpu.matmul %23, %2, %cst_11 {dimension_numbers = #tpu.dot_dimension_numbers<[1], [0], [0], [1], [0, 0, 1, 1], [], []>} : vector<8x128xf32>, vector<128x128xf32>, vector<8x128xf32> -> vector<8x128xf32>
    %25 = vector.extract_strided_slice %10 {offsets = [0, 128], sizes = [8, 128], strides = [1, 1]} : vector<8x256xf32> to vector<8x128xf32>
    %26 = arith.addf %24, %25 : vector<8x128xf32>
    %27 = vector.broadcast %7 : vector<1x128xf32> to vector<8x128xf32>
    %28 = arith.addf %26, %27 : vector<8x128xf32>
    %cst_12 = arith.constant 0.000000e+00 : f32
    %29 = vector.broadcast %cst_12 : f32 to vector<8x128xf32>
    %30 = arith.cmpf ogt, %28, %29 : vector<8x128xf32>
    %31 = math.exp %28 : vector<8x128xf32>
    %cst_13 = arith.constant 1.000000e+00 : f32
    %32 = vector.broadcast %cst_13 : f32 to vector<8x128xf32>
    %33 = arith.subf %31, %32 : vector<8x128xf32>
    %cst_14 = arith.constant 1.67326319 : f32
    %34 = vector.broadcast %cst_14 : f32 to vector<8x128xf32>
    %35 = arith.mulf %34, %33 : vector<8x128xf32>
    %36 = arith.select %30, %28, %35 : vector<8x128xi1>, vector<8x128xf32>
    %cst_15 = arith.constant 1.05070102 : f32
    %37 = vector.broadcast %cst_15 : f32 to vector<8x128xf32>
    %38 = arith.mulf %37, %36 : vector<8x128xf32>
    %cst_16 = arith.constant dense<0.000000e+00> : vector<8x128xf32>
    %39 = tpu.matmul %38, %3, %cst_16 {dimension_numbers = #tpu.dot_dimension_numbers<[1], [0], [0], [1], [0, 0, 1, 1], [], []>} : vector<8x128xf32>, vector<128x128xf32>, vector<8x128xf32> -> vector<8x128xf32>
    %40 = vector.broadcast %8 : vector<1x128xf32> to vector<8x128xf32>
    %41 = arith.addf %39, %40 : vector<8x128xf32>
    %cst_17 = arith.constant 0.000000e+00 : f32
    %42 = vector.broadcast %cst_17 : f32 to vector<8x128xf32>
    %43 = arith.cmpf ogt, %41, %42 : vector<8x128xf32>
    %44 = math.exp %41 : vector<8x128xf32>
    %cst_18 = arith.constant 1.000000e+00 : f32
    %45 = vector.broadcast %cst_18 : f32 to vector<8x128xf32>
    %46 = arith.subf %44, %45 : vector<8x128xf32>
    %cst_19 = arith.constant 1.67326319 : f32
    %47 = vector.broadcast %cst_19 : f32 to vector<8x128xf32>
    %48 = arith.mulf %47, %46 : vector<8x128xf32>
    %49 = arith.select %43, %41, %48 : vector<8x128xi1>, vector<8x128xf32>
    %cst_20 = arith.constant 1.05070102 : f32
    %50 = vector.broadcast %cst_20 : f32 to vector<8x128xf32>
    %51 = arith.mulf %50, %49 : vector<8x128xf32>
    %52 = vector.broadcast %4 : vector<1x128xf32> to vector<8x128xf32>
    %53 = arith.mulf %51, %52 : vector<8x128xf32>
    %cst_21 = arith.constant dense<0.000000e+00> : vector<8xf32>
    %54 = vector.multi_reduction <add>, %53, %cst_21 [1] : vector<8x128xf32> to vector<8xf32>
    %55 = vector.shape_cast %54 : vector<8xf32> to vector<8x1xf32>
    %56 = vector.broadcast %9 : vector<1x1xf32> to vector<8x1xf32>
    %57 = arith.addf %55, %56 : vector<8x1xf32>
    %58 = vector.shape_cast %57 : vector<8x1xf32> to vector<8x1xf32>
    %59 = vector.broadcast %58 : vector<8x1xf32> to vector<8x128xf32>
    %c0_22 = arith.constant 0 : index
    %c0_23 = arith.constant 0 : index
    %60 = vector.load %arg3[%c0_22, %c0_23] : memref<8x128xf32, #tpu.memory_space<vmem>>, vector<8x128xf32>
    tpu.vector_store %arg3[%c0_22, %c0_23], %59 {strides = array<i32>} : memref<8x128xf32, #tpu.memory_space<vmem>>, vector<8x128xf32>,
    return
  }
  func.func @transform_0(%arg0: i32) -> (i32, i32) {
    %c0_i32 = arith.constant 0 : i32
    %c0_i32_0 = arith.constant 0 : i32
    return %arg0, %c0_i32 : i32, i32
  }
  func.func @transform_1(%arg0: i32) -> (i32, i32) {
    %c0_i32 = arith.constant 0 : i32
    %c0_i32_0 = arith.constant 0 : i32
    %c0_i32_1 = arith.constant 0 : i32
    return %c0_i32, %c0_i32_0 : i32, i32
  }
  func.func @transform_2(%arg0: i32) -> (i32, i32) {
    %c0_i32 = arith.constant 0 : i32
    %c0_i32_0 = arith.constant 0 : i32
    return %arg0, %c0_i32 : i32, i32
  }
}

</mosaic_0001>

<bundles_post_ra>
// kernel: tpu_custom_call.1
= control target key start
LH: loop header
LB: loop body
LE: loop exit
PB: predicated region body
PF: predicated region fallthrough
CT: control target
= control target key end

     0   :  { %7 = vsyncpa [#allocation3], 0  ;;  %s1122_s0 = inlined_call_operand.hbm [shape: f32[16,24], index: 0, kind: input, shape index: {}]   ;;  %s1123_s1 = inlined_call_operand.hbm [shape: f32[296,256], index: 1, kind: input, shape index: {}]   ;;  %s1124_s2 = inlined_call_operand.hbm [shape: f32[16,128], index: 2, kind: output, shape index: {}]  }
   0x1   :  { %9 = vsyncpa [#allocation3 + $0x1], 0 }
   0x2   :  { %10 = vsyncpa [#allocation6], 0 }
   0x3   :  { %11 = vsyncpa [#allocation4], 0 }
   0x4   :  { %13 = vsyncpa [#allocation4 + $0x1], 0  ;;  %s911_s9 = smov 0   ;;  %s913_s10 = smov 0  }
   0x5   :  { %s915_s11 = smov 0   ;;  %s917_s12 = smov 0  }
   0x6 LB: > { %s932_s13 = sadd.s32 4294967295, %s886_s12   ;;  %s573_s14 = sadd.s32 4294967294, %s886_s12   ;;  %s886_s12 = sphi %s917_s12, %s1146_s12   ;;  %s882_s11 = sphi %s915_s11, %s1145_s11   ;;  %s878_s10 = sphi %s913_s10, %s1144_s10   ;;  %s874_s9 = sphi %s911_s9, %s1143_s9  }
   0x7   : > { %p39_p0 = scmp.ne.s32.totalorder %s878_s10, %s874_s9  ;;  %p1125_p1 = scmp.eq.s32.totalorder %s932_s13, 0 }
   0x8   : > { %p90_p3 = scmp.eq.s32.totalorder %s573_s14, 1  ;;  %p574_p5 = scmp.ge.s32.totalorder %s886_s12, 1 }
   0x9   : > { %p941_p4 = por %p1125_p1, %p39_p0  ;;  %p97_p7 = scmp.lt.s32.totalorder %s886_s12, 3 }
   0xa   : > { %p946_p6 = por %p90_p3, %p39_p0  ;;  %s888_s18 = smov [#allocation5]  }
   0xb   : > { %s1129_s15 = scalar_select %p941_p4, 1, 0 }
   0xc   : > { %s1130_s16 = scalar_select %p946_p6, 1, 0 }
   0xd   : > { %p951_p8 = pnand %p574_p5, %p97_p7  ;;  %s109_s19 = sshll.u32 %s888_s18, 4  ;;  %s110_s19 = int_to_ptr.vmem [resolvable:$true] %s109_s19 }
   0xe   : > { %s965_s21 = sadd.s32 1, %s886_s12   ;;  %s26_s22 = sadd.s32 1, %s882_s11 }
   0xf   : > { %s1131_s17 = scalar_select %p951_p8, 1, 0 }
  0x10   : > { %p703_p9 = pneg %p951_p8  ;;  %s23_s23 = ssub.s32 %s886_s12, %s965_s21 }
  0x11   : > { %s775_s24 = scalar_lea.vmem %s110_s19, 9472  ;;  %p783_p5 = scmp.lt.s32.totalorder %s110_s19, %s110_s19 }
  0x12   : > { %p960_p11 = pnand %p703_p9, %p1125_p1  ;;  %p776_p13 = scmp.ne.s32.totalorder %s110_s19, %s775_s24 }
  0x13   : > { %p784_p7 = scmp.lt.s32.totalorder %s775_s24, %s775_s24 }
  0x14   : > { %p766_p12 = pneg %p960_p11 }
  0x15   : > { %p785_p10 = por %p784_p7, %p783_p5 }
  0x16   : > { %p778_p0 = pnand %p776_p13, %p766_p12 }
  0x18   : > { %p779_p3 = pneg %p778_p0 }
  0x1a   : > { %p786_p2 = pnand %p785_p10, %p779_p3 }
  0x1c   : > { %789 = shalt.err (!%p786_p2)
}
  0x1d   : > { %s889_s25 = smov 256   ;;  %s890_s26 = smov 16  }
  0x1e   : > { %706 = dma.hbm_to_vmem [thread:$0]  (!%p960_p11), %s1123_s1, 9472, %s110_s19, [#allocation6], %s889_s25, %s889_s25, %s890_s26  }
  0x1f   : > { %p24_p9 = scmp.eq.s32.totalorder %s23_s23, 0  ;;  %p33_p12 = scmp.ne.s32.totalorder %s882_s11, %s878_s10 }
  0x20   : > { %p34_p10 = scmp.eq.s32.totalorder %s886_s12, 0  ;;  %p716_p2 = scmp.lt.s32.totalorder %s886_s12, 2 }
  0x21   : > { %s982_s29 = scalar_select %p24_p9, %s882_s11, %s26_s22  }
  0x22   : > { %p35_p13 = por %p34_p10, %p33_p12  ;;  %p1133_p0 = scmp.eq.s32.totalorder %s932_s13, 1 }
  0x23   : > { %s123_s3 = sand.u32 1, %s882_s11   ;;  %s578_s4 = sshll.u32 %s886_s12, 7 }
  0x24   : > { %p986_p3 = por %p1133_p0, %p33_p12  ;;  %s577_s5 = sshll.u32 %s123_s3, 3 }
  0x25   : > { %s995_s8 = scalar_lea.hbm %s1122_s0, %s578_s4  ;;  %s127_s14 = scalar_lea.vmem [#allocation2], %s577_s5 }
  0x26   : > { %s1134_s30 = scalar_select %p986_p3, 1, 0 }
  0x27   : > { %s134_s18 = sshll.u32 %s127_s14, 4  ;;  %p997_p11 = pnand %p716_p2, %p35_p13  ;;  %s135_s18 = int_to_ptr.vmem [resolvable:$true] %s134_s18 }
  0x28   : > { %s124_s20 = scalar_lea.sflag [#allocation3], %s123_s3  ;;  %s790_s22 = scalar_lea.hbm %s995_s8, 128 }
  0x29   : > { %p791_p5 = scmp.ne.s32.totalorder %s995_s8, %s790_s22  ;;  %p792_p7 = pneg %p997_p11 }
  0x2a   : > { %s795_s25 = scalar_lea.hbm %s1122_s0, 256  ;;  %p796_p10 = scmp.lt.s32.totalorder %s995_s8, %s1122_s0 }
  0x2b   : > { %p793_p9 = pnand %p792_p7, %p791_p5  ;;  %p797_p2 = scmp.lt.s32.totalorder %s795_s25, %s790_s22 }
  0x2d   : > { %p794_p12 = pneg %p793_p9  ;;  %p798_p13 = por %p797_p2, %p796_p10 }
  0x2f   : > { %p799_p0 = pnand %p798_p13, %p794_p12 }
  0x31   : > { %802 = shalt.err (!%p799_p0)
}
  0x32   : > { %s803_s28 = scalar_lea.vmem %s135_s18, 128  ;;  %s891_s3 = smov [#allocation2]  }
  0x33   : > { %p804_p1 = scmp.ne.s32.totalorder %s135_s18, %s803_s28  ;;  %s808_s4 = sshll.u32 %s891_s3, 4  ;;  %s809_s4 = int_to_ptr.vmem [resolvable:$false] %s808_s4 }
  0x34   : > { %s810_s5 = scalar_lea.vmem %s809_s4, 256  ;;  %p811_p5 = scmp.lt.s32.totalorder %s135_s18, %s809_s4 }
  0x35   : > { %p806_p6 = pnand %p804_p1, %p792_p7  ;;  %p812_p9 = scmp.lt.s32.totalorder %s810_s5, %s803_s28 }
  0x37   : > { %p807_p3 = pneg %p806_p6  ;;  %p813_p4 = por %p812_p9, %p811_p5 }
  0x39   : > { %p814_p8 = pnand %p813_p4, %p807_p3 }
  0x3b   : > { %817 = shalt.err (!%p814_p8)
}
  0x3c   : > { %710 = dma.hbm_to_vmem [thread:$0]  (!%p997_p11), %s995_s8, 128, %s135_s18, %s124_s20  }
  0x3d   : > { %p1136_p12 = scmp.ne.s32.totalorder %s1131_s17, 0 }
  0x3e   : > { %s1018_s6 = sand.u32 (!%p1136_p12), 1, %s878_s10   ;;  %p1137_p1 = scmp.ne.s32.totalorder (!%p1136_p12), %s1129_s15, 0 }
  0x3f   : > { %143 = sbr.rel (%p1136_p12) target bundleno = 1015 (0x3f7), region = 28  ;;  %s580_s7 = sshll.u32 (!%p1136_p12), %s1018_s6, 3 }
  0x40   : > { %s146_s14 = scalar_lea.sflag (!%p1136_p12), [#allocation3], %s1018_s6  ;;  %s149_s22 = scalar_lea.vmem (!%p1136_p12), [#allocation2], %s580_s7 }
  0x44   : > { %861 = dma.done.wait (%p1137_p1), %s146_s14, 128  }
  0x45   : > { %863 = vsyncadd (%p1137_p1), %s146_s14, 4294967168  ;;  %p1138_p4 = scmp.eq.s32.totalorder %s932_s13, 0 }
  0x47   : > { %865 = dma.done.wait (%p1138_p4), [#allocation6], 9472   ;;  %p1139_p6 = pmov %p1138_p4 }
  0x48   : > { %v892_v0 = vmov 0.0   ;;  %v180_v1 = vld [vmem:[#allocation5 + $0x28] sm:$0xff]  ;;  %v179_v2 = vld [vmem:[#allocation5 + $0x20] sm:$0xff]  ;;  %v178_v3 = vld [vmem:[#allocation5 + $0x18] sm:$0xff]  ;;  %vm215_vm0 = vcmask 195584   ;;  %vm893_vm1 = vmmov 0   ;;  %v290_v26 = vlaneseq }
  0x49   : > { %867 = vsyncadd (%p1139_p6), [#allocation6], 4294957824  ;;  %283 = vmatprep.mubr.f32.mxu0 %v892_v0  ;;  %625 = vmatprep.subr.mxu1 %v892_v0  ;;  %v177_v4 = vld [vmem:[#allocation5 + $0x10] sm:$0xff]  ;;  %v176_v5 = vld [vmem:[#allocation5 + $0x8] sm:$0xff]  ;;  %s173_s15 = scalar_lea.vmem [#allocation7], %s580_s7  ;;  %s588_s8 = sshll.u32 %s932_s13, 7 }
  0x4a   : > { %245 = vmatprep.subr.mxu0 %v180_v1  ;;  %v196_v6 = vld [vmem:[#allocation5 + $0x120] sm:$0xff]  ;;  %v195_v7 = vld [vmem:[#allocation5 + $0x110] sm:$0xff]  ;;  %657 = vmatprep.mubr.msk.f32.mxu1 %vm893_vm1, %v892_v0  ;;  %v1054_v27 = vshrl.u32 %v290_v26, 7  ;;  %s493_s17 = sshll.u32 %s173_s15, 4  ;;  %s491_s20 = scalar_lea.hbm %s1124_s2, %s588_s8  ;;  %s1082_s17 = int_to_ptr.vmem [resolvable:$true] %s493_s17 }
  0x4b   : > { %246 = vmatpush1.msra.mxu0 %v179_v2  ;;  %v175_v8 = vld [vmem:[#allocation5] sm:$0xff]  ;;  %626 = vmatpush3.msra.mxu1 %v196_v6  ;;  %v174_v9 = vld [vmem:[%s149_s22] sm:$0xff]  ;;  %s480_s23 = scalar_lea.sflag [#allocation4], %s1018_s6  ;;  %s818_s24 = scalar_lea.vmem %s1082_s17, 128 }
  0x4c   : > { %247 = vmatprep.subr.mxu0 %v178_v3  ;;  %627 = vmatprep.subr.mxu1 %v892_v0  ;;  %v194_v10 = vld [vmem:[#allocation5 + $0x100] sm:$0xff]  ;;  %v193_v11 = vld [vmem:[#allocation5 + $0xf0] sm:$0xff]  ;;  %v292_v28 = vsub.s32 0, %v1054_v27  ;;  %v374_v53 = vsub.s32 1, %v1054_v27  ;;  %p819_p8 = scmp.ne.s32.totalorder %s1082_s17, %s818_s24  ;;  %p1140_p3 = scmp.ne.s32.totalorder %s1134_s30, 0 }
  0x4d   : > { %248 = vmatpush1.msra.mxu0 %v177_v4  ;;  %628 = vmatpush3.msra.mxu1 %v195_v7  ;;  %v192_v12 = vld [vmem:[#allocation5 + $0xe0] sm:$0xff]  ;;  %v191_v13 = vld [vmem:[#allocation5 + $0xd0] sm:$0xff]  ;;  %s895_s25 = smov [#allocation7]  }
  0x4e   : > { %249 = vmatprep.subr.mxu0 %v176_v5  ;;  %629 = vmatprep.subr.mxu1 %v892_v0  ;;  %v190_v14 = vld [vmem:[#allocation5 + $0xc0] sm:$0xff]  ;;  %v189_v15 = vld [vmem:[#allocation5 + $0xb0] sm:$0xff]  ;;  %p820_p11 = pnand %p819_p8, %p1140_p3  ;;  %s822_s26 = sshll.u32 %s895_s25, 4  ;;  %s823_s26 = int_to_ptr.vmem [resolvable:$false] %s822_s26 }
  0x4f   : > { %250 = vmatpush1.msra.mxu0 %v175_v8  ;;  %630 = vmatpush3.msra.mxu1 %v194_v10  ;;  %v188_v16 = vld [vmem:[#allocation5 + $0xa0] sm:$0xff]  ;;  %v187_v17 = vld [vmem:[#allocation5 + $0x90] sm:$0xff]  ;;  %s824_s13 = scalar_lea.vmem %s823_s26, 256  ;;  %p825_p10 = scmp.lt.s32.totalorder %s1082_s17, %s823_s26 }
  0x50   : > { %583 = vmatmul.mubr.msk.f32.vlgmr.msra.gmra.mxu0 %vm215_vm0, %v174_v9  ;;  %631 = vmatprep.subr.mxu1 %v892_v0  ;;  %v186_v18 = vld [vmem:[#allocation5 + $0x80] sm:$0xff]  ;;  %v185_v19 = vld [vmem:[#allocation5 + $0x70] sm:$0xff]  ;;  %p821_p7 = pneg %p820_p11  ;;  %p826_p2 = scmp.lt.s32.totalorder %s824_s13, %s818_s24 }
  0x51   : > { %660 = vmatprep.subr.mxu0 %v892_v0  ;;  %632 = vmatpush3.msra.mxu1 %v193_v11  ;;  %v184_v20 = vld [vmem:[#allocation5 + $0x60] sm:$0xff]  ;;  %v183_v21 = vld [vmem:[#allocation5 + $0x50] sm:$0xff] }
  0x52   : > { %633 = vmatprep.subr.mxu1 %v892_v0  ;;  %v182_v22 = vld [vmem:[#allocation5 + $0x40] sm:$0xff]  ;;  %692 = vmatprep.mubr.msk.f32.mxu0 %vm893_vm1, %v892_v0  ;;  %v181_v23 = vld [vmem:[#allocation5 + $0x30] sm:$0xff]  ;;  %p827_p13 = por %p826_p2, %p825_p10 }
  0x53   : > { %634 = vmatpush3.msra.mxu1 %v192_v12  ;;  %v212_v24 = vld [vmem:[#allocation5 + $0x220] sm:$0xff]  ;;  %v211_v25 = vld [vmem:[#allocation5 + $0x210] sm:$0xff] }
  0x54   : > { %635 = vmatprep.subr.mxu1 %v892_v0  ;;  %661 = vmatpush3.msra.mxu0 %v212_v24  ;;  %v1057_v29 = vld [vmem:[#allocation5 + $0x240] sm:$0xff]  ;;  %v209_v40 = vld [vmem:[#allocation5 + $0x1f0] sm:$0xff]  ;;  %p828_p0 = pnand %p827_p13, %p821_p7 }
  0x55   : > { %636 = vmatpush3.msra.mxu1 %v191_v13  ;;  %662 = vmatprep.subr.mxu0 %v892_v0  ;;  %v293_v30 = vrot.slane %v1057_v29, %v292_v28  ;;  %v210_v39 = vld [vmem:[#allocation5 + $0x200] sm:$0xff]  ;;  %v207_v42 = vld [vmem:[#allocation5 + $0x1d0] sm:$0xff]  ;;  %v375_v54 = vrot.slane %v1057_v29, %v374_v53 }
  0x56   : > { %637 = vmatprep.subr.mxu1 %v892_v0  ;;  %663 = vmatpush3.msra.mxu0 %v211_v25  ;;  %v208_v41 = vld [vmem:[#allocation5 + $0x1e0] sm:$0xff]  ;;  %v205_v44 = vld [vmem:[#allocation5 + $0x1b0] sm:$0xff] }
  0x57   : > { %638 = vmatpush3.msra.mxu1 %v190_v14  ;;  %664 = vmatprep.subr.mxu0 %v892_v0  ;;  %v206_v43 = vld [vmem:[#allocation5 + $0x1c0] sm:$0xff]  ;;  %v203_v46 = vld [vmem:[#allocation5 + $0x190] sm:$0xff] }
  0x58   : > { %639 = vmatprep.subr.mxu1 %v892_v0  ;;  %665 = vmatpush3.msra.mxu0 %v210_v39  ;;  %v204_v45 = vld [vmem:[#allocation5 + $0x1a0] sm:$0xff]  ;;  %v201_v48 = vld [vmem:[#allocation5 + $0x170] sm:$0xff] }
  0x59   : > { %640 = vmatpush3.msra.mxu1 %v189_v15  ;;  %666 = vmatprep.subr.mxu0 %v892_v0  ;;  %v202_v47 = vld [vmem:[#allocation5 + $0x180] sm:$0xff]  ;;  %v199_v50 = vld [vmem:[#allocation5 + $0x150] sm:$0xff]  ;;  %v894_v15 = vmov 0  }
  0x5a   : > { %641 = vmatprep.subr.mxu1 %v892_v0  ;;  %667 = vmatpush3.msra.mxu0 %v209_v40  ;;  %v200_v49 = vld [vmem:[#allocation5 + $0x160] sm:$0xff]  ;;  %v197_v52 = vld [vmem:[#allocation5 + $0x130] sm:$0xff] }
  0x5b   : > { %642 = vmatpush3.msra.mxu1 %v188_v16  ;;  %668 = vmatprep.subr.mxu0 %v892_v0  ;;  %v198_v51 = vld [vmem:[#allocation5 + $0x140] sm:$0xff]  ;;  %v213_v11 = vld [vmem:[#allocation5 + $0x230] ss:$0 sm:$0xff]  ;;  %v470_v16 = vsub.s32 3, %v1054_v27 }
  0x5c   : > { %643 = vmatprep.subr.mxu1 %v892_v0  ;;  %669 = vmatpush3.msra.mxu0 %v208_v41 }
  0x5d   : > { %644 = vmatpush3.msra.mxu1 %v187_v17  ;;  %670 = vmatprep.subr.mxu0 %v892_v0  ;;  %v471_v17 = vrot.slane %v1057_v29, %v470_v16 }
  0x5e   : > { %645 = vmatprep.subr.mxu1 %v892_v0  ;;  %671 = vmatpush3.msra.mxu0 %v207_v42 }
  0x5f   : > { %646 = vmatpush3.msra.mxu1 %v186_v18  ;;  %672 = vmatprep.subr.mxu0 %v892_v0 }
  0x60   : > { %647 = vmatprep.subr.mxu1 %v892_v0  ;;  %673 = vmatpush3.msra.mxu0 %v206_v43 }
  0x61   : > { %648 = vmatpush3.msra.mxu1 %v185_v19  ;;  %674 = vmatprep.subr.mxu0 %v892_v0 }
  0x62   : > { %649 = vmatprep.subr.mxu1 %v892_v0  ;;  %675 = vmatpush3.msra.mxu0 %v205_v44 }
  0x63   : > { %650 = vmatpush3.msra.mxu1 %v184_v20  ;;  %676 = vmatprep.subr.mxu0 %v892_v0 }
  0x64   : > { %651 = vmatprep.subr.mxu1 %v892_v0  ;;  %677 = vmatpush3.msra.mxu0 %v204_v45 }
  0x65   : > { %652 = vmatpush3.msra.mxu1 %v183_v21  ;;  %678 = vmatprep.subr.mxu0 %v892_v0 }
  0x66   : > { %653 = vmatprep.subr.mxu1 %v892_v0  ;;  %679 = vmatpush3.msra.mxu0 %v203_v46 }
  0x67   : > { %654 = vmatpush3.msra.mxu1 %v182_v22  ;;  %680 = vmatprep.subr.mxu0 %v892_v0 }
  0x68   : > { %655 = vmatprep.subr.mxu1 %v892_v0  ;;  %681 = vmatpush3.msra.mxu0 %v202_v47 }
  0x69   : > { %656 = vmatpush3.msra.mxu1 %v181_v23  ;;  %682 = vmatprep.subr.mxu0 %v892_v0 }
  0x6a   : > { %683 = vmatpush3.msra.mxu0 %v201_v48  ;;  %757 = vset.pattern.permute.xlu0 %v894_v15 }
  0x6b   : > { %684 = vmatprep.subr.mxu0 %v892_v0 }
  0x6c   : > { %685 = vmatpush3.msra.mxu0 %v200_v49 }
  0x6d   : > { %686 = vmatprep.subr.mxu0 %v892_v0 }
  0x6e   : > { %687 = vmatpush3.msra.mxu0 %v199_v50 }
  0x6f   : > { %688 = vmatprep.subr.mxu0 %v892_v0 }
  0x70   : > { %689 = vmatpush3.msra.mxu0 %v198_v51 }
  0x71   : > { %690 = vmatprep.subr.mxu0 %v892_v0  ;;  %v386_v0 = vsub.s32 2, %v1054_v27 }
  0x72   : > { %691 = vmatpush3.msra.mxu0 %v197_v52 }
  0x73   : > { %v387_v3 = vrot.slane %v1057_v29, %v386_v0 }
 0x110   : > { %v285_v31 = vpop.f32.mrf.mxu0 }
 0x111   : > { %v294_v32 = vadd.f32 %v293_v30, %v285_v31 }
 0x112   : > { %v287_v55 = vpop.f32.mrf.mxu0 }
 0x113   : > { %v296_v33 = vmul.f32 1.442695, %v294_v32  ;;  %vm295_vm2 = vcmp.gt.f32.partialorder %v294_v32, 0.0 }
 0x115   : > { %758 = vpow2.f32 %v296_v33 }
 0x122   : > { %v759_v34 = vpop.eup %758 }
 0x123   : > { %v584_v35 = vadd.f32 -1.0, %v759_v34 }
 0x125   : > { %v299_v36 = vmul.f32 1.6732632, %v584_v35 }
 0x127   : > { %v300_v37 = vsel %vm295_vm2, %v294_v32, %v299_v36 }
 0x128   : > { %v301_v38 = vmul.f32 1.050701, %v300_v37 }
 0x12a   : > { %658 = vmatmul.mubr.f32.vlgmr.msra.gmra.mxu1 %v301_v38 }
 0x1ea   : > { %v368_v56 = vpop.f32.mrf.mxu1 }
 0x1eb   : > { %v369_v57 = vadd.f32 %v368_v56, %v287_v55 }
 0x1ec   : > { %v659_v58 = vpop.f32.mrf.mxu1 }
 0x1ed   : > { %v376_v59 = vadd.f32 %v375_v54, %v369_v57 }
 0x1ef   : > { %v378_v60 = vmul.f32 1.442695, %v376_v59  ;;  %vm377_vm3 = vcmp.gt.f32.partialorder %v376_v59, 0.0 }
 0x1f1   : > { %760 = vpow2.f32 %v378_v60 }
 0x1fe   : > { %v761_v61 = vpop.eup %760 }
 0x1ff   : > { %v585_v62 = vadd.f32 -1.0, %v761_v61 }
 0x201   : > { %v381_v63 = vmul.f32 1.6732632, %v585_v62 }
 0x203   : > { %v382_v1 = vsel %vm377_vm3, %v376_v59, %v381_v63 }
 0x204   : > { %v383_v2 = vmul.f32 1.050701, %v382_v1 }
 0x206   : > { %693 = vmatmul.mubr.f32.vlgmr.msra.gmra.mxu0 %v383_v2 }
 0x2c6   : > { %v454_v4 = vpop.f32.mrf.mxu0 }
 0x2c7   : > { %v455_v5 = vadd.f32 %v454_v4, %v387_v3 }
 0x2c8   : > { %v694_v6 = vpop.f32.mrf.mxu0 }
 0x2c9   : > { %v459_v7 = vmul.f32 1.442695, %v455_v5  ;;  %vm458_vm4 = vcmp.gt.f32.partialorder %v455_v5, 0.0 }
 0x2cb   : > { %762 = vpow2.f32 %v459_v7 }
 0x2d8   : > { %v763_v8 = vpop.eup %762 }
 0x2d9   : > { %v586_v9 = vadd.f32 -1.0, %v763_v8 }
 0x2db   : > { %v462_v10 = vmul.f32 1.6732632, %v586_v9 }
 0x2dd   : > { %v463_v12 = vsel %vm458_vm4, %v455_v5, %v462_v10 }
 0x2de   : > { %v464_v13 = vmul.f32 1.050701, %v463_v12 }
 0x2e0   : > { %v465_v14 = vmul.f32 %v464_v13, %v213_v11 }
 0x2e2   : > { %466 = vadd.xlane.f32.xlu0 %v465_v14 }
 0x36b   : > { %v467_v18 = vpop.xlane.xlu0 %466 }
 0x36c   : > { %v472_v19 = vadd.f32 %v471_v17, %v467_v18 }
 0x36e   : > { %475 = vperm.xlu0 %757, %v472_v19  }
 0x3e9   : > { %v476_v20 = vpop.permute.xlu0 %475 }
 0x3ea   : > { %478 = vst [vmem:[%s173_s15] sm:$0xff] %v476_v20 }
 0x3eb   : > { %831 = shalt.err (!%p828_p0)
}
 0x3ec   : > { %s832_s27 = scalar_lea.hbm %s491_s20, 128  ;;  %s836_s4 = scalar_lea.hbm %s1124_s2, 256 }
 0x3ed   : > { %p833_p5 = scmp.ne.s32.totalorder %s491_s20, %s832_s27  ;;  %p837_p1 = scmp.lt.s32.totalorder %s491_s20, %s1124_s2 }
 0x3ee   : > { %p838_p4 = scmp.lt.s32.totalorder %s836_s4, %s832_s27 }
 0x3ef   : > { %p834_p9 = pnand %p833_p5, %p1140_p3 }
 0x3f0   : > { %p839_p6 = por %p838_p4, %p837_p1 }
 0x3f1   : > { %p835_p12 = pneg %p834_p9 }
 0x3f3   : > { %p840_p8 = pnand %p839_p6, %p835_p12 }
 0x3f5   : > { %843 = shalt.err (!%p840_p8)
}
 0x3f6   : > { %701 = dma.vmem_to_hbm [thread:$0]  (%p1140_p3), %s1082_s17, 128, %s491_s20, %s480_s23  }
 0x3f7 PF: > { %s505_s7 = sand.u32 1, %s874_s9   ;;  %p1141_p11 = scmp.ne.s32.totalorder %s1130_s16, 0 }
 0x3f8   : > { %p1142_p7 = scmp.ge.s32.totalorder %s886_s12, 2  ;;  %s506_s14 = scalar_lea.sflag [#allocation4], %s505_s7 }
 0x3fa   : > { %p712_p10 = pnand %p1142_p7, %p1141_p11 }
 0x3fc   : > { %p713_p2 = pneg %p712_p10 }
 0x3fe   : > { %869 = dma.done.wait (%p713_p2), %s506_s14, 128  }
 0x3ff   : > { %871 = vsyncadd (%p713_p2), %s506_s14, 4294967168  ;;  %p16_p13 = scmp.ge.s32.totalorder %s965_s21, 4   ;;  %s1143_s9 = smov %s878_s10 }
 0x400   : > { %s1144_s10 = smov %s882_s11  ;;  %s1145_s11 = smov %s982_s29 }
 0x401   : > { %s1146_s12 = smov %s965_s21  ;;  %18 = sbr.rel (!%p16_p13) target bundleno = 6 (0x6), region = 77 }
 0x406   :  { %511 = vsyncpa [#allocation3], 1 }
 0x407   :  { %513 = vsyncpa [#allocation3 + $0x1], 1 }
 0x408   :  { %514 = vsyncpa [#allocation6], 1 }
 0x409   :  { %515 = vsyncpa [#allocation4], 1 }
 0x40a   :  { %517 = vsyncpa [#allocation4 + $0x1], 1 }

</bundles_post_ra>
